<compile_context>
chip_gen: v6e
topology: v6e:2x2x1
jax: 0.10.0
libtpu: 0.0.40
codegen_flags: <defaults>
</compile_context>

<pallas_src>
import functools

import numpy as np
import jax
import jax.numpy as jnp
from jax.experimental import pallas as pl
from jax.experimental.pallas import tpu as pltpu

LANE = 128  # TPU lane width; feature dims are zero-padded to a multiple of this


def _round_up(n, m):
    return ((n + m - 1) // m) * m


# ----------------------------- kernel body -----------------------------------

def mlp_kernel(x_ref, vecs_ref, w_ref, o_ref):
    """x_ref: (B, L) zero-padded input; vecs_ref: (8, L) packed
    gamma/beta/b1..b4/w5-row/b5; w_ref: (4, L, L) zero-padded fc1..fc4 weights
    (f32 or bf16); o_ref: (B, L) lane-dense output slab (col 0 = result)."""
    x = x_ref[...]                                   # (B, L) f32
    B = x.shape[0]

    # ---- BatchNorm1d, training-mode batch statistics (eps=1e-5) ----
    # Padded lanes are all-zero and gamma/beta are zero-padded -> they stay 0.
    gamma = vecs_ref[0:1, :]                         # (1, L)
    beta = vecs_ref[1:2, :]                          # (1, L)
    mu = jnp.mean(x, axis=0, keepdims=True)
    xc = x - mu
    var = jnp.mean(xc * xc, axis=0, keepdims=True)
    h = xc * jax.lax.rsqrt(var + 1e-5) * gamma + beta    # (B, L) f32

    # ---- fc_1 .. fc_4 with swish: fixed lane-dense (B, L) slab on the MXU ----
    w_dtype = w_ref.dtype                            # bf16 by default (f32 option)
    for i in range(4):                               # static unroll (4 MXU passes)
        w = w_ref[i]                                 # (L, L) zero-padded
        b = vecs_ref[2 + i:3 + i, :]                 # (1, L) zero-padded
        z = jnp.dot(h.astype(w_dtype), w,
                    preferred_element_type=jnp.float32) + b
        h = z * jax.nn.sigmoid(z)                    # swish, f32 on VPU/EUP

    # ---- fc_5 (dim//8 -> 1) on VPU/XLU: mul by w5 row + lane reduction ----
    w5_row = vecs_ref[6:7, :]                        # (1, L), zero outside live lanes
    b5_row = vecs_ref[7:8, :]                        # (1, L), b5 broadcast to all lanes
    s = jnp.sum(h * w5_row, axis=-1, keepdims=True)              # (B, 1)
    o_ref[...] = jnp.broadcast_to(s, (B, o_ref.shape[-1])) + b5_row   # unmasked vst


# -------------------- one-time (host-side) parameter packing ------------------

def pack_params(params, dim, weight_dtype=jnp.bfloat16):
    """Pack natural (torch-like) params into 2 lane-dense device arrays.
    Call ONCE at parameter-load time; do not put on the per-call path."""
    L = max(LANE, _round_up(dim, LANE))
    dims = [dim, dim, dim // 2, dim // 4, dim // 8, 1]

    vecs = np.zeros((8, L), np.float32)
    vecs[0, :dim] = np.asarray(params["gamma"])
    vecs[1, :dim] = np.asarray(params["beta"])
    for i in range(4):
        vecs[2 + i, :dims[i + 1]] = np.asarray(params["bs"][i])
    vecs[6, :dims[4]] = np.asarray(params["ws"][4][:, 0])     # w5 as a row
    vecs[7, :] = float(np.asarray(params["bs"][4])[0])        # b5 broadcast

    wstack = np.zeros((4, L, L), np.float32)
    for i in range(4):
        wstack[i, :dims[i], :dims[i + 1]] = np.asarray(params["ws"][i])

    return jnp.asarray(vecs), jnp.asarray(wstack, dtype=weight_dtype)


def _cost_estimate(P, B, L, wstack):
    flops = int(P * B * (2 * 4 * L * L + 12 * L))            # padded matmuls + BN/swish
    transcendentals = int(P * B * 4 * L)                     # sigmoids
    bytes_accessed = int(P * 2 * B * L * 4 + 8 * L * 4
                         + wstack.size * wstack.dtype.itemsize)
    return pl.CostEstimate(flops=flops, transcendentals=transcendentals,
                           bytes_accessed=bytes_accessed)


# ------------------------------ forward wrappers ------------------------------

@jax.jit
def mlp_forward(x, vecs, wstack):
    """Single problem: x (B, D) -> (B,).  Params must be pre-packed."""
    B, D = x.shape
    L = vecs.shape[-1]
    xp = jnp.pad(x.astype(jnp.float32), ((0, 0), (0, L - D)))   # lane-dense input

    out = pl.pallas_call(
        mlp_kernel,
        out_shape=jax.ShapeDtypeStruct((B, L), jnp.float32),
        cost_estimate=_cost_estimate(1, B, L, wstack),
        # whole problem fits in one VMEM block -> no grid / BlockSpecs needed
    )(xp, vecs, wstack)
    return out[:, 0]                                             # .squeeze(1)


@jax.jit
def mlp_forward_stacked(xs, vecs, wstack):
    """P independent problems in one gridded pallas_call: xs (P, B, D) -> (P, B).
    Leading axis is marked "parallel" (shards across v7x's two TensorCores)."""
    P, B, D = xs.shape
    L = vecs.shape[-1]
    xp = jnp.pad(xs.astype(jnp.float32), ((0, 0), (0, 0), (0, L - D)))

    grid_spec = pltpu.PrefetchScalarGridSpec(
        num_scalar_prefetch=0,
        grid=(P,),
        in_specs=[
            pl.BlockSpec((None, B, L), lambda p: (p, 0, 0)),       # per-problem x
            pl.BlockSpec((8, L), lambda p: (0, 0)),                # shared vecs
            pl.BlockSpec((4, L, L), lambda p: (0, 0, 0)),          # shared weights
        ],
        out_specs=pl.BlockSpec((None, B, L), lambda p: (p, 0, 0)),
    )
    out = pl.pallas_call(
        mlp_kernel,
        out_shape=jax.ShapeDtypeStruct((P, B, L), jnp.float32),
        grid_spec=grid_spec,
        compiler_params=pltpu.CompilerParams(dimension_semantics=("parallel",)),
        cost_estimate=_cost_estimate(P, B, L, wstack),
    )(xp, vecs, wstack)
    return out[:, :, 0]


# ---------------- parameter construction & pure-JAX reference ----------------

def xavier_uniform(key, fan_in, fan_out):
    limit = (6.0 / (fan_in + fan_out)) ** 0.5
    return jax.random.uniform(key, (fan_in, fan_out),
                              minval=-limit, maxval=limit, dtype=jnp.float32)


def make_params(dim, key):
    dims = [dim, dim, dim // 2, dim // 4, dim // 8, 1]
    keys = jax.random.split(key, 5)
    ws, bs = [], []
    for i in range(5):
        ws.append(xavier_uniform(keys[i], dims[i], dims[i + 1]))
        bs.append(jnp.zeros((dims[i + 1],), jnp.float32))
    return {"gamma": jnp.ones((dim,), jnp.float32),
            "beta": jnp.zeros((dim,), jnp.float32),
            "ws": ws, "bs": bs}


def reference_forward(x, params):
    mu = jnp.mean(x, axis=0, keepdims=True)
    var = jnp.mean((x - mu) ** 2, axis=0, keepdims=True)
    h = (x - mu) / jnp.sqrt(var + 1e-5) * params["gamma"] + params["beta"]
    for i in range(4):
        h = h @ params["ws"][i] + params["bs"][i]
        h = h * jax.nn.sigmoid(h)
    h = h @ params["ws"][4] + params["bs"][4]
    return h[:, 0]


if __name__ == "__main__":
    B, DIM = 8, 32  # model_input = 32 -> hidden sizes 32, 16, 8, 4, 1
    key = jax.random.PRNGKey(0)
    kx, kp, ks = jax.random.split(key, 3)
    x = jax.random.normal(kx, (B, DIM), dtype=jnp.float32)
    params = make_params(DIM, kp)

    # One-time packing (hoisted out of the per-call path).
    vecs_f32, wstack_f32 = pack_params(params, DIM, weight_dtype=jnp.float32)
    vecs_bf16, wstack_bf16 = pack_params(params, DIM)          # bf16 default

    y_ref = reference_forward(x, params)

    # Tight correctness check with f32-stored weights.
    y_f32 = jax.block_until_ready(mlp_forward(x, vecs_f32, wstack_f32))
    assert y_f32.shape == (B,)
    assert jnp.allclose(y_f32, y_ref, atol=1e-5, rtol=1e-5), (y_f32, y_ref)

    # Default path: bf16 MXU operands / bf16 weight storage (halved weight DMA).
    y = jax.block_until_ready(mlp_forward(x, vecs_bf16, wstack_bf16))
    assert jnp.allclose(y, y_ref, atol=5e-2, rtol=5e-2), (y, y_ref)

    # Stacked path: P independent problems in one "parallel"-gridded pallas_call.
    P = 4
    xs = jax.random.normal(ks, (P, B, DIM), dtype=jnp.float32)
    ys = jax.block_until_ready(mlp_forward_stacked(xs, vecs_bf16, wstack_bf16))
    ys_ref = jnp.stack([reference_forward(xs[p], params) for p in range(P)])
    assert ys.shape == (P, B)
    assert jnp.allclose(ys, ys_ref, atol=5e-2, rtol=5e-2), (ys, ys_ref)

    print("KERNEL_OK")
</pallas_src>

<mosaic_0001>
module attributes {stable_mosaic.version = 11 : i64} {
  func.func @mlp_kernel(%arg0: memref<8x128xf32, #tpu.memory_space<vmem>>, %arg1: memref<8x128xf32, #tpu.memory_space<vmem>>, %arg2: memref<4x128x128xf32, #tpu.memory_space<vmem>>, %arg3: memref<8x128xf32, #tpu.memory_space<vmem>>) attributes {dimension_semantics = [], scalar_prefetch = 0 : i64, scratch_operands = 0 : i64, tpu.core_type = #tpu.core_type<tc>} {
    %c0 = arith.constant 0 : index
    %c0_0 = arith.constant 0 : index
    %0 = vector.load %arg0[%c0, %c0_0] : memref<8x128xf32, #tpu.memory_space<vmem>>, vector<8x128xf32>
    %c0_1 = arith.constant 0 : index
    %c0_2 = arith.constant 0 : index
    %1 = vector.load %arg1[%c0_1, %c0_2] : memref<8x128xf32, #tpu.memory_space<vmem>>, vector<1x128xf32>
    %c1 = arith.constant 1 : index
    %c0_3 = arith.constant 0 : index
    %2 = vector.load %arg1[%c1, %c0_3] : memref<8x128xf32, #tpu.memory_space<vmem>>, vector<1x128xf32>
    %cst = arith.constant dense<0.000000e+00> : vector<128xf32>
    %3 = vector.multi_reduction <add>, %0, %cst [0] : vector<8x128xf32> to vector<128xf32>
    %4 = vector.shape_cast %3 : vector<128xf32> to vector<1x128xf32>
    %cst_4 = arith.constant 8.000000e+00 : f32
    %5 = vector.broadcast %cst_4 : f32 to vector<1x128xf32>
    %6 = arith.divf %4, %5 : vector<1x128xf32>
    %7 = vector.broadcast %6 : vector<1x128xf32> to vector<8x128xf32>
    %8 = arith.subf %0, %7 : vector<8x128xf32>
    %9 = arith.mulf %8, %8 : vector<8x128xf32>
    %cst_5 = arith.constant dense<0.000000e+00> : vector<128xf32>
    %10 = vector.multi_reduction <add>, %9, %cst_5 [0] : vector<8x128xf32> to vector<128xf32>
    %11 = vector.shape_cast %10 : vector<128xf32> to vector<1x128xf32>
    %cst_6 = arith.constant 8.000000e+00 : f32
    %12 = vector.broadcast %cst_6 : f32 to vector<1x128xf32>
    %13 = arith.divf %11, %12 : vector<1x128xf32>
    %cst_7 = arith.constant 9.99999974E-6 : f32
    %14 = vector.broadcast %cst_7 : f32 to vector<1x128xf32>
    %15 = arith.addf %13, %14 : vector<1x128xf32>
    %16 = math.rsqrt %15 : vector<1x128xf32>
    %17 = vector.broadcast %16 : vector<1x128xf32> to vector<8x128xf32>
    %18 = arith.mulf %8, %17 : vector<8x128xf32>
    %19 = vector.broadcast %1 : vector<1x128xf32> to vector<8x128xf32>
    %20 = arith.mulf %18, %19 : vector<8x128xf32>
    %21 = vector.broadcast %2 : vector<1x128xf32> to vector<8x128xf32>
    %22 = arith.addf %20, %21 : vector<8x128xf32>
    %c0_8 = arith.constant 0 : index
    %c0_9 = arith.constant 0 : index
    %c0_10 = arith.constant 0 : index
    %23 = vector.load %arg2[%c0_8, %c0_9, %c0_10] : memref<4x128x128xf32, #tpu.memory_space<vmem>>, vector<1x128x128xf32>
    %24 = vector.shape_cast %23 : vector<1x128x128xf32> to vector<128x128xf32>
    %c2 = arith.constant 2 : index
    %c0_11 = arith.constant 0 : index
    %25 = vector.load %arg1[%c2, %c0_11] : memref<8x128xf32, #tpu.memory_space<vmem>>, vector<1x128xf32>
    %cst_12 = arith.constant dense<0.000000e+00> : vector<8x128xf32>
    %26 = tpu.matmul %22, %24, %cst_12 {dimension_numbers = #tpu.dot_dimension_numbers<[1], [0], [0], [1], [0, 0, 1, 1], [], []>} : vector<8x128xf32>, vector<128x128xf32>, vector<8x128xf32> -> vector<8x128xf32>
    %27 = vector.broadcast %25 : vector<1x128xf32> to vector<8x128xf32>
    %28 = arith.addf %26, %27 : vector<8x128xf32>
    %29 = arith.negf %28 : vector<8x128xf32>
    %30 = math.exp %29 : vector<8x128xf32>
    %cst_13 = arith.constant 1.000000e+00 : f32
    %31 = vector.broadcast %cst_13 : f32 to vector<8x128xf32>
    %32 = arith.addf %31, %30 : vector<8x128xf32>
    %33 = arith.divf %31, %32 : vector<8x128xf32>
    %34 = arith.mulf %28, %33 : vector<8x128xf32>
    %c1_14 = arith.constant 1 : index
    %c0_15 = arith.constant 0 : index
    %c0_16 = arith.constant 0 : index
    %35 = vector.load %arg2[%c1_14, %c0_15, %c0_16] : memref<4x128x128xf32, #tpu.memory_space<vmem>>, vector<1x128x128xf32>
    %36 = vector.shape_cast %35 : vector<1x128x128xf32> to vector<128x128xf32>
    %c3 = arith.constant 3 : index
    %c0_17 = arith.constant 0 : index
    %37 = vector.load %arg1[%c3, %c0_17] : memref<8x128xf32, #tpu.memory_space<vmem>>, vector<1x128xf32>
    %cst_18 = arith.constant dense<0.000000e+00> : vector<8x128xf32>
    %38 = tpu.matmul %34, %36, %cst_18 {dimension_numbers = #tpu.dot_dimension_numbers<[1], [0], [0], [1], [0, 0, 1, 1], [], []>} : vector<8x128xf32>, vector<128x128xf32>, vector<8x128xf32> -> vector<8x128xf32>
    %39 = vector.broadcast %37 : vector<1x128xf32> to vector<8x128xf32>
    %40 = arith.addf %38, %39 : vector<8x128xf32>
    %41 = arith.negf %40 : vector<8x128xf32>
    %42 = math.exp %41 : vector<8x128xf32>
    %cst_19 = arith.constant 1.000000e+00 : f32
    %43 = vector.broadcast %cst_19 : f32 to vector<8x128xf32>
    %44 = arith.addf %43, %42 : vector<8x128xf32>
    %45 = arith.divf %43, %44 : vector<8x128xf32>
    %46 = arith.mulf %40, %45 : vector<8x128xf32>
    %c2_20 = arith.constant 2 : index
    %c0_21 = arith.constant 0 : index
    %c0_22 = arith.constant 0 : index
    %47 = vector.load %arg2[%c2_20, %c0_21, %c0_22] : memref<4x128x128xf32, #tpu.memory_space<vmem>>, vector<1x128x128xf32>
    %48 = vector.shape_cast %47 : vector<1x128x128xf32> to vector<128x128xf32>
    %c4 = arith.constant 4 : index
    %c0_23 = arith.constant 0 : index
    %49 = vector.load %arg1[%c4, %c0_23] : memref<8x128xf32, #tpu.memory_space<vmem>>, vector<1x128xf32>
    %cst_24 = arith.constant dense<0.000000e+00> : vector<8x128xf32>
    %50 = tpu.matmul %46, %48, %cst_24 {dimension_numbers = #tpu.dot_dimension_numbers<[1], [0], [0], [1], [0, 0, 1, 1], [], []>} : vector<8x128xf32>, vector<128x128xf32>, vector<8x128xf32> -> vector<8x128xf32>
    %51 = vector.broadcast %49 : vector<1x128xf32> to vector<8x128xf32>
    %52 = arith.addf %50, %51 : vector<8x128xf32>
    %53 = arith.negf %52 : vector<8x128xf32>
    %54 = math.exp %53 : vector<8x128xf32>
    %cst_25 = arith.constant 1.000000e+00 : f32
    %55 = vector.broadcast %cst_25 : f32 to vector<8x128xf32>
    %56 = arith.addf %55, %54 : vector<8x128xf32>
    %57 = arith.divf %55, %56 : vector<8x128xf32>
    %58 = arith.mulf %52, %57 : vector<8x128xf32>
    %c3_26 = arith.constant 3 : index
    %c0_27 = arith.constant 0 : index
    %c0_28 = arith.constant 0 : index
    %59 = vector.load %arg2[%c3_26, %c0_27, %c0_28] : memref<4x128x128xf32, #tpu.memory_space<vmem>>, vector<1x128x128xf32>
    %60 = vector.shape_cast %59 : vector<1x128x128xf32> to vector<128x128xf32>
    %c5 = arith.constant 5 : index
    %c0_29 = arith.constant 0 : index
    %61 = vector.load %arg1[%c5, %c0_29] : memref<8x128xf32, #tpu.memory_space<vmem>>, vector<1x128xf32>
    %cst_30 = arith.constant dense<0.000000e+00> : vector<8x128xf32>
    %62 = tpu.matmul %58, %60, %cst_30 {dimension_numbers = #tpu.dot_dimension_numbers<[1], [0], [0], [1], [0, 0, 1, 1], [], []>} : vector<8x128xf32>, vector<128x128xf32>, vector<8x128xf32> -> vector<8x128xf32>
    %63 = vector.broadcast %61 : vector<1x128xf32> to vector<8x128xf32>
    %64 = arith.addf %62, %63 : vector<8x128xf32>
    %65 = arith.negf %64 : vector<8x128xf32>
    %66 = math.exp %65 : vector<8x128xf32>
    %cst_31 = arith.constant 1.000000e+00 : f32
    %67 = vector.broadcast %cst_31 : f32 to vector<8x128xf32>
    %68 = arith.addf %67, %66 : vector<8x128xf32>
    %69 = arith.divf %67, %68 : vector<8x128xf32>
    %70 = arith.mulf %64, %69 : vector<8x128xf32>
    %c6 = arith.constant 6 : index
    %c0_32 = arith.constant 0 : index
    %71 = vector.load %arg1[%c6, %c0_32] : memref<8x128xf32, #tpu.memory_space<vmem>>, vector<1x128xf32>
    %c7 = arith.constant 7 : index
    %c0_33 = arith.constant 0 : index
    %72 = vector.load %arg1[%c7, %c0_33] : memref<8x128xf32, #tpu.memory_space<vmem>>, vector<1x128xf32>
    %73 = vector.broadcast %71 : vector<1x128xf32> to vector<8x128xf32>
    %74 = arith.mulf %70, %73 : vector<8x128xf32>
    %cst_34 = arith.constant dense<0.000000e+00> : vector<8xf32>
    %75 = vector.multi_reduction <add>, %74, %cst_34 [1] : vector<8x128xf32> to vector<8xf32>
    %76 = vector.shape_cast %75 : vector<8xf32> to vector<8x1xf32>
    %77 = vector.shape_cast %76 : vector<8x1xf32> to vector<8x1xf32>
    %78 = vector.broadcast %77 : vector<8x1xf32> to vector<8x128xf32>
    %79 = vector.broadcast %72 : vector<1x128xf32> to vector<8x128xf32>
    %80 = arith.addf %78, %79 : vector<8x128xf32>
    %c0_35 = arith.constant 0 : index
    %c0_36 = arith.constant 0 : index
    %81 = vector.load %arg3[%c0_35, %c0_36] : memref<8x128xf32, #tpu.memory_space<vmem>>, vector<8x128xf32>
    tpu.vector_store %arg3[%c0_35, %c0_36], %80 {strides = array<i32>} : memref<8x128xf32, #tpu.memory_space<vmem>>, vector<8x128xf32>,
    return
  }
}

</mosaic_0001>

<bundles_post_ra>
// kernel: mlp_forward.1
= control target key start
LH: loop header
LB: loop body
LE: loop exit
PB: predicated region body
PF: predicated region fallthrough
CT: control target
= control target key end

     0   :  { %8 = vsyncpa [#allocation3], 0  ;;  %s741_s12 = smov [#allocation2]   ;;  %s871_s0 = inlined_call_operand.vmem [shape: f32[8,128], index: 0, kind: input, shape index: {}]   ;;  %s872_s1 = inlined_call_operand.vmem [shape: f32[8,128], index: 1, kind: input, shape index: {}]   ;;  %s873_s2 = inlined_call_operand.hbm [shape: f32[4,128,128], index: 2, kind: input, shape index: {}]   ;;  %s874_s3 = inlined_call_operand.vmem [shape: f32[8,128], index: 3, kind: output, shape index: {}]  }
   0x1   :  { %s18_s13 = sshll.u32 %s741_s12, 4  ;;  %s19_s13 = int_to_ptr.vmem [resolvable:$true] %s18_s13 }
   0x2   :  { %s727_s14 = scalar_lea.vmem %s19_s13, 8192  ;;  %p732_p1 = scmp.lt.s32.totalorder %s19_s13, %s19_s13 }
   0x3   :  { %p728_p0 = scmp.ne.s32.totalorder %s19_s13, %s727_s14  ;;  %p733_p2 = scmp.lt.s32.totalorder %s727_s14, %s727_s14 }
   0x5   :  { %p734_p3 = por %p733_p2, %p732_p1 }
   0x7   :  { %p735_p4 = pnand %p734_p3, %p728_p0 }
   0x9   :  { %738 = shalt.err (!%p735_p4)
}
   0xa   :  { %s742_s15 = smov 128   ;;  %s743_s16 = smov 8  }
   0xb   :  { %24 = dma.hbm_to_vmem [thread:$0]  %s873_s2, 8192, %s19_s13, [#allocation3], %s742_s15, %s742_s15, %s743_s16  }
   0xc   :  { %739 = dma.done.wait [#allocation3], 8192  }
   0xd   :  { %740 = vsyncadd [#allocation3], 4294959104  ;;  %v744_v0 = vmov 0.0   ;;  %vm745_vm0 = vmmov 0   ;;  %v76_v1 = vld [vmem:[#allocation2 + $0x78] sm:$0xff]  ;;  %v75_v2 = vld [vmem:[#allocation2 + $0x70] sm:$0xff] }
   0xe   :  { %556 = vmatprep.subr.mxu0 %v744_v0  ;;  %588 = vmatprep.mubr.msk.f32.mxu0 %vm745_vm0, %v744_v0  ;;  %v74_v3 = vld [vmem:[#allocation2 + $0x68] sm:$0xff]  ;;  %v73_v4 = vld [vmem:[#allocation2 + $0x60] sm:$0xff]  ;;  %v72_v6 = vld [vmem:[#allocation2 + $0x58] sm:$0xff] }
   0xf   :  { %591 = vmatprep.subr.mxu1 %v744_v0  ;;  %623 = vmatprep.mubr.msk.f32.mxu1 %vm745_vm0, %v744_v0  ;;  %v28_v5 = vld [vmem:[%s871_s0] sm:$0xff]  ;;  %v71_v8 = vld [vmem:[#allocation2 + $0x50] sm:$0xff]  ;;  %v70_v10 = vld [vmem:[#allocation2 + $0x48] sm:$0xff] }
  0x10   :  { %557 = vmatpush3.msra.mxu0 %v76_v1  ;;  %v31_v7 = vrot.slane %v28_v5, 4  ;;  %v69_v12 = vld [vmem:[#allocation2 + $0x40] sm:$0xff]  ;;  %v68_v14 = vld [vmem:[#allocation2 + $0x38] sm:$0xff]  ;;  %v67_v16 = vld [vmem:[#allocation2 + $0x30] sm:$0xff] }
  0x11   :  { %558 = vmatprep.subr.mxu0 %v744_v0  ;;  %v66_v18 = vld [vmem:[#allocation2 + $0x28] sm:$0xff]  ;;  %v65_v20 = vld [vmem:[#allocation2 + $0x20] sm:$0xff]  ;;  %v64_v22 = vld [vmem:[#allocation2 + $0x18] sm:$0xff] }
  0x12   :  { %559 = vmatpush3.msra.mxu0 %v75_v2  ;;  %v32_v9 = vadd.f32 %v31_v7, %v28_v5  ;;  %v63_v24 = vld [vmem:[#allocation2 + $0x10] sm:$0xff]  ;;  %v62_v26 = vld [vmem:[#allocation2 + $0x8] sm:$0xff]  ;;  %v61_v28 = vld [vmem:[#allocation2] sm:$0xff] }
  0x13   :  { %560 = vmatprep.subr.mxu0 %v744_v0  ;;  %v476_v36 = vld [vmem:[%s872_s1] ss:$0 sm:$0xff]  ;;  %v477_v38 = vld [vmem:[%s872_s1 + $0x1] ss:$0 sm:$0xff]  ;;  %v175_v41 = vld [vmem:[#allocation2 + $0xf8] sm:$0xff] }
  0x14   :  { %561 = vmatpush3.msra.mxu0 %v74_v3  ;;  %v33_v11 = vrot.slane %v32_v9, 2  ;;  %592 = vmatpush3.msra.mxu1 %v175_v41  ;;  %v174_v42 = vld [vmem:[#allocation2 + $0xf0] sm:$0xff]  ;;  %v173_v43 = vld [vmem:[#allocation2 + $0xe8] sm:$0xff]  ;;  %v172_v44 = vld [vmem:[#allocation2 + $0xe0] sm:$0xff] }
  0x15   :  { %562 = vmatprep.subr.mxu0 %v744_v0  ;;  %593 = vmatprep.subr.mxu1 %v744_v0  ;;  %v171_v45 = vld [vmem:[#allocation2 + $0xd8] sm:$0xff]  ;;  %v170_v46 = vld [vmem:[#allocation2 + $0xd0] sm:$0xff]  ;;  %v169_v47 = vld [vmem:[#allocation2 + $0xc8] sm:$0xff] }
  0x16   :  { %563 = vmatpush3.msra.mxu0 %v73_v4  ;;  %v34_v13 = vadd.f32 %v33_v11, %v32_v9  ;;  %594 = vmatpush3.msra.mxu1 %v174_v42  ;;  %v168_v48 = vld [vmem:[#allocation2 + $0xc0] sm:$0xff]  ;;  %v167_v49 = vld [vmem:[#allocation2 + $0xb8] sm:$0xff]  ;;  %v166_v50 = vld [vmem:[#allocation2 + $0xb0] sm:$0xff] }
  0x17   :  { %564 = vmatprep.subr.mxu0 %v744_v0  ;;  %595 = vmatprep.subr.mxu1 %v744_v0  ;;  %v165_v51 = vld [vmem:[#allocation2 + $0xa8] sm:$0xff]  ;;  %v164_v52 = vld [vmem:[#allocation2 + $0xa0] sm:$0xff]  ;;  %v163_v53 = vld [vmem:[#allocation2 + $0x98] sm:$0xff] }
  0x18   :  { %565 = vmatpush3.msra.mxu0 %v72_v6  ;;  %v35_v15 = vrot.slane %v34_v13, 1  ;;  %596 = vmatpush3.msra.mxu1 %v173_v43  ;;  %v162_v54 = vld [vmem:[#allocation2 + $0x90] sm:$0xff]  ;;  %v161_v55 = vld [vmem:[#allocation2 + $0x88] sm:$0xff]  ;;  %v160_v56 = vld [vmem:[#allocation2 + $0x80] sm:$0xff] }
  0x19   :  { %566 = vmatprep.subr.mxu0 %v744_v0  ;;  %597 = vmatprep.subr.mxu1 %v744_v0  ;;  %v478_v57 = vld [vmem:[%s872_s1 + $0x2] ss:$0 sm:$0xff]  ;;  %v274_v3 = vld [vmem:[#allocation2 + $0x178] sm:$0xff]  ;;  %v273_v4 = vld [vmem:[#allocation2 + $0x170] sm:$0xff] }
  0x1a   :  { %567 = vmatpush3.msra.mxu0 %v71_v8  ;;  %v36_v17 = vadd.f32 %v35_v15, %v34_v13  ;;  %598 = vmatpush3.msra.mxu1 %v172_v44  ;;  %v271_v6 = vld [vmem:[#allocation2 + $0x160] sm:$0xff]  ;;  %v270_v7 = vld [vmem:[#allocation2 + $0x158] sm:$0xff]  ;;  %v269_v8 = vld [vmem:[#allocation2 + $0x150] sm:$0xff] }
  0x1b   :  { %568 = vmatprep.subr.mxu0 %v744_v0  ;;  %599 = vmatprep.subr.mxu1 %v744_v0  ;;  %v268_v9 = vld [vmem:[#allocation2 + $0x148] sm:$0xff]  ;;  %v266_v11 = vld [vmem:[#allocation2 + $0x138] sm:$0xff]  ;;  %v360_v41 = vld [vmem:[#allocation2 + $0x190] sm:$0xff] }
  0x1c   :  { %569 = vmatpush3.msra.mxu0 %v70_v10  ;;  %v38_v19 = vmul.f32 0.125, %v36_v17  ;;  %600 = vmatpush3.msra.mxu1 %v171_v45  ;;  %v267_v10 = vld [vmem:[#allocation2 + $0x140] sm:$0xff]  ;;  %v264_v13 = vld [vmem:[#allocation2 + $0x128] sm:$0xff]  ;;  %v262_v15 = vld [vmem:[#allocation2 + $0x118] sm:$0xff] }
  0x1d   :  { %570 = vmatprep.subr.mxu0 %v744_v0  ;;  %601 = vmatprep.subr.mxu1 %v744_v0  ;;  %v260_v17 = vld [vmem:[#allocation2 + $0x108] sm:$0xff]  ;;  %v358_v43 = vld [vmem:[#allocation2 + $0x180] sm:$0xff] }
  0x1e   :  { %571 = vmatpush3.msra.mxu0 %v69_v12  ;;  %v39_v21 = vsub.f32 %v28_v5, %v38_v19  ;;  %602 = vmatpush3.msra.mxu1 %v170_v46  ;;  %v272_v5 = vld [vmem:[#allocation2 + $0x168] sm:$0xff]  ;;  %v265_v12 = vld [vmem:[#allocation2 + $0x130] sm:$0xff]  ;;  %v480_v19 = vld [vmem:[%s872_s1 + $0x3] ss:$0 sm:$0xff] }
  0x1f   :  { %572 = vmatprep.subr.mxu0 %v744_v0  ;;  %603 = vmatprep.subr.mxu1 %v744_v0  ;;  %v359_v42 = vld [vmem:[#allocation2 + $0x188] sm:$0xff]  ;;  %v482_v44 = vld [vmem:[%s872_s1 + $0x4] ss:$0 sm:$0xff] }
  0x20   :  { %573 = vmatpush3.msra.mxu0 %v68_v14  ;;  %v40_v23 = vmul.f32 %v39_v21, %v39_v21  ;;  %604 = vmatpush3.msra.mxu1 %v169_v47  ;;  %v263_v14 = vld [vmem:[#allocation2 + $0x120] sm:$0xff] }
  0x21   :  { %574 = vmatprep.subr.mxu0 %v744_v0  ;;  %605 = vmatprep.subr.mxu1 %v744_v0 }
  0x22   :  { %575 = vmatpush3.msra.mxu0 %v67_v16  ;;  %v41_v25 = vrot.slane %v40_v23, 4  ;;  %606 = vmatpush3.msra.mxu1 %v168_v48  ;;  %v261_v16 = vld [vmem:[#allocation2 + $0x110] sm:$0xff] }
  0x23   :  { %576 = vmatprep.subr.mxu0 %v744_v0  ;;  %607 = vmatprep.subr.mxu1 %v744_v0 }
  0x24   :  { %577 = vmatpush3.msra.mxu0 %v66_v18  ;;  %v42_v27 = vadd.f32 %v41_v25, %v40_v23  ;;  %608 = vmatpush3.msra.mxu1 %v167_v49  ;;  %v259_v18 = vld [vmem:[#allocation2 + $0x100] sm:$0xff] }
  0x25   :  { %578 = vmatprep.subr.mxu0 %v744_v0  ;;  %609 = vmatprep.subr.mxu1 %v744_v0 }
  0x26   :  { %579 = vmatpush3.msra.mxu0 %v65_v20  ;;  %v43_v29 = vrot.slane %v42_v27, 2  ;;  %610 = vmatpush3.msra.mxu1 %v166_v50 }
  0x27   :  { %580 = vmatprep.subr.mxu0 %v744_v0  ;;  %611 = vmatprep.subr.mxu1 %v744_v0 }
  0x28   :  { %581 = vmatpush3.msra.mxu0 %v64_v22  ;;  %v44_v30 = vadd.f32 %v43_v29, %v42_v27  ;;  %612 = vmatpush3.msra.mxu1 %v165_v51  ;;  %v372_v29 = vld [vmem:[#allocation2 + $0x1f0] sm:$0xff] }
  0x29   :  { %582 = vmatprep.subr.mxu0 %v744_v0  ;;  %613 = vmatprep.subr.mxu1 %v744_v0 }
  0x2a   :  { %583 = vmatpush3.msra.mxu0 %v63_v24  ;;  %v45_v31 = vrot.slane %v44_v30, 1  ;;  %614 = vmatpush3.msra.mxu1 %v164_v52 }
  0x2b   :  { %584 = vmatprep.subr.mxu0 %v744_v0  ;;  %615 = vmatprep.subr.mxu1 %v744_v0 }
  0x2c   :  { %585 = vmatpush3.msra.mxu0 %v62_v26  ;;  %v46_v32 = vadd.f32 %v45_v31, %v44_v30  ;;  %616 = vmatpush3.msra.mxu1 %v163_v53  ;;  %v371_v30 = vld [vmem:[#allocation2 + $0x1e8] sm:$0xff]  ;;  %v370_v31 = vld [vmem:[#allocation2 + $0x1e0] sm:$0xff] }
  0x2d   :  { %586 = vmatprep.subr.mxu0 %v744_v0  ;;  %617 = vmatprep.subr.mxu1 %v744_v0 }
  0x2e   :  { %587 = vmatpush3.msra.mxu0 %v61_v28  ;;  %v47_v33 = vmul.f32 0.125, %v46_v32  ;;  %618 = vmatpush3.msra.mxu1 %v162_v54  ;;  %v373_v28 = vld [vmem:[#allocation2 + $0x1f8] sm:$0xff] }
  0x2f   :  { %626 = vmatprep.subr.mxu0 %v744_v0  ;;  %619 = vmatprep.subr.mxu1 %v744_v0  ;;  %v369_v32 = vld [vmem:[#allocation2 + $0x1d8] sm:$0xff] }
  0x30   :  { %v48_v34 = vadd.f32 1e-05, %v47_v33  ;;  %620 = vmatpush3.msra.mxu1 %v161_v55  ;;  %v368_v33 = vld [vmem:[#allocation2 + $0x1d0] sm:$0xff] }
  0x31   :  { %621 = vmatprep.subr.mxu1 %v744_v0 }
  0x32   :  { %701 = vrsqrt.f32 %v48_v34  ;;  %622 = vmatpush3.msra.mxu1 %v160_v56  ;;  %v367_v34 = vld [vmem:[#allocation2 + $0x1c8] sm:$0xff] }
  0x33   :  { %661 = vmatprep.subr.mxu1 %v744_v0 }
  0x3f   :  { %v702_v35 = vpop.eup %701 }
  0x40   :  { %v50_v37 = vmul.f32 %v702_v35, %v39_v21  ;;  %v366_v35 = vld [vmem:[#allocation2 + $0x1c0] sm:$0xff] }
  0x42   :  { %v55_v39 = vmul.f32 %v476_v36, %v50_v37  ;;  %v365_v36 = vld [vmem:[#allocation2 + $0x1b8] sm:$0xff]  ;;  %v364_v37 = vld [vmem:[#allocation2 + $0x1b0] sm:$0xff] }
  0x44   :  { %v60_v40 = vadd.f32 %v477_v38, %v55_v39  ;;  %v363_v38 = vld [vmem:[#allocation2 + $0x1a8] sm:$0xff]  ;;  %v362_v39 = vld [vmem:[#allocation2 + $0x1a0] sm:$0xff] }
  0x46   :  { %589 = vmatmul.mubr.f32.vlgmr.msra.gmra.mxu0 %v60_v40  ;;  %v361_v40 = vld [vmem:[#allocation2 + $0x198] sm:$0xff] }
  0x47   :  { %658 = vmatprep.mubr.msk.f32.mxu0 %vm745_vm0, %v744_v0  ;;  %627 = vmatpush3.msra.mxu0 %v274_v3 }
  0x48   :  { %628 = vmatprep.subr.mxu0 %v744_v0 }
  0x49   :  { %629 = vmatpush3.msra.mxu0 %v273_v4 }
  0x4a   :  { %630 = vmatprep.subr.mxu0 %v744_v0 }
  0x4b   :  { %631 = vmatpush3.msra.mxu0 %v272_v5 }
  0x4c   :  { %632 = vmatprep.subr.mxu0 %v744_v0 }
  0x4d   :  { %633 = vmatpush3.msra.mxu0 %v271_v6 }
  0x4e   :  { %634 = vmatprep.subr.mxu0 %v744_v0 }
  0x4f   :  { %635 = vmatpush3.msra.mxu0 %v270_v7 }
  0x50   :  { %636 = vmatprep.subr.mxu0 %v744_v0 }
  0x51   :  { %637 = vmatpush3.msra.mxu0 %v269_v8 }
  0x52   :  { %638 = vmatprep.subr.mxu0 %v744_v0 }
  0x53   :  { %639 = vmatpush3.msra.mxu0 %v268_v9 }
  0x54   :  { %640 = vmatprep.subr.mxu0 %v744_v0 }
  0x55   :  { %641 = vmatpush3.msra.mxu0 %v267_v10 }
  0x56   :  { %642 = vmatprep.subr.mxu0 %v744_v0 }
  0x57   :  { %643 = vmatpush3.msra.mxu0 %v266_v11 }
  0x58   :  { %644 = vmatprep.subr.mxu0 %v744_v0 }
  0x59   :  { %645 = vmatpush3.msra.mxu0 %v265_v12 }
  0x5a   :  { %646 = vmatprep.subr.mxu0 %v744_v0 }
  0x5b   :  { %647 = vmatpush3.msra.mxu0 %v264_v13 }
  0x5c   :  { %648 = vmatprep.subr.mxu0 %v744_v0 }
  0x5d   :  { %649 = vmatpush3.msra.mxu0 %v263_v14 }
  0x5e   :  { %650 = vmatprep.subr.mxu0 %v744_v0 }
  0x5f   :  { %651 = vmatpush3.msra.mxu0 %v262_v15 }
  0x60   :  { %652 = vmatprep.subr.mxu0 %v744_v0 }
  0x61   :  { %653 = vmatpush3.msra.mxu0 %v261_v16 }
  0x62   :  { %654 = vmatprep.subr.mxu0 %v744_v0 }
  0x63   :  { %655 = vmatpush3.msra.mxu0 %v260_v17 }
  0x64   :  { %656 = vmatprep.subr.mxu0 %v744_v0 }
  0x65   :  { %657 = vmatpush3.msra.mxu0 %v259_v18 }
 0x106   :  { %v148_v58 = vpop.f32.mrf.mxu0 }
 0x107   :  { %v149_v59 = vadd.f32 %v478_v57, %v148_v58 }
 0x108   :  { %v590_v60 = vpop.f32.mrf.mxu0 }
 0x109   :  { %v479_v61 = vmul.f32 -1.442695, %v149_v59  ;;  %v486_v60 = vld [vmem:[%s872_s1 + $0x6] ss:$0 sm:$0xff] }
 0x10b   :  { %703 = vpow2.f32 %v479_v61 }
 0x118   :  { %v704_v62 = vpop.eup %703 }
 0x119   :  { %v155_v63 = vadd.f32 1.0, %v704_v62 }
 0x11b   :  { %705 = vrcp.f32 %v155_v63  ;;  %v487_v63 = vld [vmem:[%s872_s1 + $0x7] ss:$0 sm:$0xff] }
 0x128   :  { %v706_v1 = vpop.eup %705 }
 0x129   :  { %v158_v2 = vmul.f32 %v706_v1, %v149_v59 }
 0x12b   :  { %624 = vmatmul.mubr.f32.vlgmr.msra.gmra.mxu1 %v158_v2 }
 0x12c   :  { %693 = vmatprep.mubr.msk.f32.mxu1 %vm745_vm0, %v744_v0  ;;  %662 = vmatpush3.msra.mxu1 %v373_v28 }
 0x12d   :  { %663 = vmatprep.subr.mxu1 %v744_v0 }
 0x12e   :  { %664 = vmatpush3.msra.mxu1 %v372_v29 }
 0x12f   :  { %665 = vmatprep.subr.mxu1 %v744_v0 }
 0x130   :  { %666 = vmatpush3.msra.mxu1 %v371_v30 }
 0x131   :  { %667 = vmatprep.subr.mxu1 %v744_v0 }
 0x132   :  { %668 = vmatpush3.msra.mxu1 %v370_v31 }
 0x133   :  { %669 = vmatprep.subr.mxu1 %v744_v0 }
 0x134   :  { %670 = vmatpush3.msra.mxu1 %v369_v32 }
 0x135   :  { %671 = vmatprep.subr.mxu1 %v744_v0 }
 0x136   :  { %672 = vmatpush3.msra.mxu1 %v368_v33 }
 0x137   :  { %673 = vmatprep.subr.mxu1 %v744_v0 }
 0x138   :  { %674 = vmatpush3.msra.mxu1 %v367_v34 }
 0x139   :  { %675 = vmatprep.subr.mxu1 %v744_v0 }
 0x13a   :  { %676 = vmatpush3.msra.mxu1 %v366_v35 }
 0x13b   :  { %677 = vmatprep.subr.mxu1 %v744_v0 }
 0x13c   :  { %678 = vmatpush3.msra.mxu1 %v365_v36 }
 0x13d   :  { %679 = vmatprep.subr.mxu1 %v744_v0 }
 0x13e   :  { %680 = vmatpush3.msra.mxu1 %v364_v37 }
 0x13f   :  { %681 = vmatprep.subr.mxu1 %v744_v0 }
 0x140   :  { %682 = vmatpush3.msra.mxu1 %v363_v38 }
 0x141   :  { %683 = vmatprep.subr.mxu1 %v744_v0 }
 0x142   :  { %684 = vmatpush3.msra.mxu1 %v362_v39 }
 0x143   :  { %685 = vmatprep.subr.mxu1 %v744_v0 }
 0x144   :  { %686 = vmatpush3.msra.mxu1 %v361_v40 }
 0x145   :  { %687 = vmatprep.subr.mxu1 %v744_v0 }
 0x146   :  { %688 = vmatpush3.msra.mxu1 %v360_v41 }
 0x147   :  { %689 = vmatprep.subr.mxu1 %v744_v0 }
 0x148   :  { %690 = vmatpush3.msra.mxu1 %v359_v42 }
 0x149   :  { %691 = vmatprep.subr.mxu1 %v744_v0  ;;  %v484_v0 = vld [vmem:[%s872_s1 + $0x5] ss:$0 sm:$0xff] }
 0x14a   :  { %692 = vmatpush3.msra.mxu1 %v358_v43 }
 0x1eb   :  { %v247_v20 = vpop.f32.mrf.mxu1 }
 0x1ec   :  { %v248_v21 = vadd.f32 %v480_v19, %v247_v20 }
 0x1ed   :  { %v625_v22 = vpop.f32.mrf.mxu1 }
 0x1ee   :  { %v481_v23 = vmul.f32 -1.442695, %v248_v21 }
 0x1f0   :  { %707 = vpow2.f32 %v481_v23 }
 0x1fd   :  { %v708_v24 = vpop.eup %707 }
 0x1fe   :  { %v254_v25 = vadd.f32 1.0, %v708_v24 }
 0x200   :  { %709 = vrcp.f32 %v254_v25 }
 0x20d   :  { %v710_v26 = vpop.eup %709 }
 0x20e   :  { %v257_v27 = vmul.f32 %v710_v26, %v248_v21 }
 0x210   :  { %659 = vmatmul.mubr.f32.vlgmr.msra.gmra.mxu0 %v257_v27 }
 0x2d0   :  { %v346_v45 = vpop.f32.mrf.mxu0 }
 0x2d1   :  { %v347_v46 = vadd.f32 %v482_v44, %v346_v45 }
 0x2d2   :  { %v660_v47 = vpop.f32.mrf.mxu0 }
 0x2d3   :  { %v483_v48 = vmul.f32 -1.442695, %v347_v46 }
 0x2d5   :  { %711 = vpow2.f32 %v483_v48 }
 0x2e2   :  { %v712_v49 = vpop.eup %711 }
 0x2e3   :  { %v353_v50 = vadd.f32 1.0, %v712_v49 }
 0x2e5   :  { %713 = vrcp.f32 %v353_v50 }
 0x2f2   :  { %v714_v51 = vpop.eup %713 }
 0x2f3   :  { %v356_v52 = vmul.f32 %v714_v51, %v347_v46 }
 0x2f5   :  { %694 = vmatmul.mubr.f32.vlgmr.msra.gmra.mxu1 %v356_v52 }
 0x3b5   :  { %v445_v53 = vpop.f32.mrf.mxu1 }
 0x3b6   :  { %v446_v54 = vadd.f32 %v484_v0, %v445_v53 }
 0x3b7   :  { %v695_v55 = vpop.f32.mrf.mxu1 }
 0x3b8   :  { %v485_v56 = vmul.f32 -1.442695, %v446_v54 }
 0x3ba   :  { %715 = vpow2.f32 %v485_v56 }
 0x3c7   :  { %v716_v57 = vpop.eup %715 }
 0x3c8   :  { %v452_v58 = vadd.f32 1.0, %v716_v57 }
 0x3ca   :  { %717 = vrcp.f32 %v452_v58 }
 0x3d7   :  { %v718_v59 = vpop.eup %717 }
 0x3d8   :  { %v455_v61 = vmul.f32 %v718_v59, %v446_v54 }
 0x3da   :  { %v462_v62 = vmul.f32 %v486_v60, %v455_v61 }
 0x3dc   :  { %463 = vadd.xlane.f32.xlu0 %v462_v62 }
 0x465   :  { %v464_v1 = vpop.xlane.xlu0 %463 }
 0x466   :  { %v469_v2 = vadd.f32 %v487_v63, %v464_v1 }
 0x468   :  { %470 = vst [vmem:[%s874_s3] sm:$0xff] %v469_v2 }
 0x469   :  { %475 = vsyncpa [#allocation3], 1 }

</bundles_post_ra>
